<compile_context>
chip_gen: v7x
topology: tpu7x:2x2x1
jax: 0.10.0
libtpu: 0.0.40
codegen_flags: <defaults>
</compile_context>

<pallas_src>
import math

import jax
import jax.numpy as jnp
import numpy as np
from jax.experimental import pallas as pl
from jax.experimental.pallas import tpu as pltpu


def _f_tiling(F):
    # Split the feature dim into 2 parallel tiles when legal (v7x has 2 TCs).
    # (8,128) rule: tile_f must be divisible by 8 or equal F.
    if F % 16 == 0:
        return F // 2, 2
    return F, 1


def _hw_tiling(HW, candidates=(8192, 4096, 2048, 1024, 512)):
    # One lane-dense block at small sizes; split very large H*W so the output
    # block stays well under VMEM and the pipeline overlaps DMA with compute.
    if HW % 128 == 0:
        for cand in candidates:
            if HW > cand and HW % cand == 0:
                return cand, HW // cand
    return HW, 1


def position_embedding_sine(x, mask=None, *, num_pos_feats=64,
                            temperature=10000.0, normalize=False, scale=None):
    """JAX/Pallas equivalent of PositionEmbeddingSine.forward(x, mask).

    x: (B, C, H, W); mask: optional (B, H, W) bool. Returns (B, num_pos_feats, H, W) f32.
    """
    if scale is not None and not normalize:
        raise ValueError("normalize should be True if scale is passed")
    if scale is None:
        scale = 2.0 * math.pi

    B, _, H, W = x.shape
    F = num_pos_feats
    HW = H * W
    eps = 1e-6

    # Host constants (float64 -> f32):
    #   inv_dim_t[j] = 1 / temperature ** (2 * (j // 2) / F)
    #   phase[j]     = 0 for even j (sin), pi/2 for odd j (cos == sin(x + pi/2))
    j = np.arange(F, dtype=np.float64)
    dim_t = np.float64(temperature) ** (2.0 * np.floor(j / 2.0) / np.float64(F))
    inv_dim_t = (1.0 / dim_t).astype(np.float32)
    phase = ((j % 2) * (np.pi / 2.0)).astype(np.float32)

    tile_f, n_f = _f_tiling(F)

    if mask is None:
        # ---------- fast path: y_embed depends only on h ----------
        y_row = np.repeat(np.arange(1, H + 1, dtype=np.float64), W)      # (HW,)
        if normalize:
            y_row = y_row / (np.float64(H) + eps) * np.float64(scale)
        y_row = y_row.astype(np.float32).reshape(1, HW)

        hw_tile, n_hw = _hw_tiling(HW)

        def kernel(y_ref, inv_ref, phase_ref, out_ref):
            # y_ref: (1, hw_tile)  inv/phase: (tile_f, 1)  out: (1, tile_f, hw_tile)
            angle = y_ref[...] * inv_ref[...] + phase_ref[...]
            out_ref[0] = jnp.sin(angle)

        out = pl.pallas_call(
            kernel,
            out_shape=jax.ShapeDtypeStruct((B, F, HW), jnp.float32),
            grid_spec=pltpu.PrefetchScalarGridSpec(
                num_scalar_prefetch=0,
                grid=(B, n_f, n_hw),
                in_specs=[
                    pl.BlockSpec((1, hw_tile), lambda b, f, k: (0, k)),
                    pl.BlockSpec((tile_f, 1), lambda b, f, k: (f, 0)),
                    pl.BlockSpec((tile_f, 1), lambda b, f, k: (f, 0)),
                ],
                out_specs=pl.BlockSpec((1, tile_f, hw_tile),
                                       lambda b, f, k: (b, f, k)),
            ),
            compiler_params=pltpu.CompilerParams(
                dimension_semantics=("parallel", "parallel", "parallel")),
        )(jnp.asarray(y_row),
          jnp.asarray(inv_dim_t.reshape(F, 1)),
          jnp.asarray(phase.reshape(F, 1)))
        # (B, F, H*W) -> (B, F, H, W): free reshape, no transpose.
        return out.reshape(B, F, H, W)

    # ---------- masked path ----------
    mask_i32 = mask.astype(jnp.int32)
    tril = np.tril(np.ones((H, H), dtype=np.float32))    # host constant
    # TODO(synk): for very large H, a log2(H)-step pltpu.roll prefix sum would
    # avoid the O(H^2) tril matmul; the MXU form is kept here for simplicity.

    def kernel(tril_ref, mask_ref, inv_ref, phase_ref, out_ref):
        # tril: (H, H)  mask: (1, H, W)  inv/phase: (tile_f, 1, 1)
        # out: (1, tile_f, H, W)
        not_mask = (1 - mask_ref[0]).astype(jnp.float32)                  # (H, W)
        # cumsum along H as a lower-triangular matmul on the MXU
        y = jnp.dot(tril_ref[...], not_mask,
                    preferred_element_type=jnp.float32)                   # (H, W)
        if normalize:
            # one (1, W) reciprocal row, then a broadcast multiply
            y = y * (jnp.float32(scale) / (y[H - 1:H, :] + eps))
        angle = y[None] * inv_ref[...] + phase_ref[...]                   # (tile_f, H, W)
        out_ref[0] = jnp.sin(angle)

    return pl.pallas_call(
        kernel,
        out_shape=jax.ShapeDtypeStruct((B, F, H, W), jnp.float32),
        grid_spec=pltpu.PrefetchScalarGridSpec(
            num_scalar_prefetch=0,
            grid=(B, n_f),
            in_specs=[
                pl.BlockSpec((H, H), lambda b, f: (0, 0)),
                pl.BlockSpec((1, H, W), lambda b, f: (b, 0, 0)),
                pl.BlockSpec((tile_f, 1, 1), lambda b, f: (f, 0, 0)),
                pl.BlockSpec((tile_f, 1, 1), lambda b, f: (f, 0, 0)),
            ],
            out_specs=pl.BlockSpec((1, tile_f, H, W),
                                   lambda b, f: (b, f, 0, 0)),
        ),
        compiler_params=pltpu.CompilerParams(
            dimension_semantics=("parallel", "parallel")),
    )(jnp.asarray(tril), mask_i32,
      jnp.asarray(inv_dim_t.reshape(F, 1, 1)),
      jnp.asarray(phase.reshape(F, 1, 1)))


def _reference(mask_bool, num_pos_feats, temperature, normalize, scale):
    """Pure-JAX reference mirroring the PyTorch forward."""
    not_mask = (~mask_bool).astype(jnp.float32)
    y_embed = jnp.cumsum(not_mask, axis=1)
    if normalize:
        eps = 1e-6
        y_embed = y_embed / (y_embed[:, -1:, :] + eps) * scale
    dim_t = jnp.arange(num_pos_feats, dtype=jnp.float32)
    dim_t = temperature ** (2.0 * jnp.floor(dim_t / 2.0) / num_pos_feats)
    pos_y = y_embed[:, :, :, None] / dim_t
    s = jnp.sin(pos_y[:, :, :, 0::2])
    c = jnp.cos(pos_y[:, :, :, 1::2])
    pos_y = jnp.stack((s, c), axis=4).reshape(pos_y.shape[:3] + (-1,))
    return jnp.transpose(pos_y, (0, 3, 1, 2))


if __name__ == "__main__":
    key = jax.random.PRNGKey(0)
    B, C, H, W = 2, 4, 16, 16
    num_pos_feats = 32
    x = jax.random.normal(key, (B, C, H, W), dtype=jnp.float32)

    # 1) default module config: mask=None, normalize=False
    pos = jax.block_until_ready(
        position_embedding_sine(x, mask=None, num_pos_feats=num_pos_feats))
    ref = _reference(jnp.zeros((B, H, W), dtype=bool), num_pos_feats,
                     10000.0, False, 2.0 * math.pi)
    np.testing.assert_allclose(np.asarray(pos), np.asarray(ref),
                               rtol=2e-5, atol=2e-5)
    assert pos.shape == (B, num_pos_feats, H, W)

    # 2) mask=None, normalize=True
    pos_n = jax.block_until_ready(
        position_embedding_sine(x, mask=None, num_pos_feats=num_pos_feats,
                                normalize=True))
    ref_n = _reference(jnp.zeros((B, H, W), dtype=bool), num_pos_feats,
                       10000.0, True, 2.0 * math.pi)
    np.testing.assert_allclose(np.asarray(pos_n), np.asarray(ref_n),
                               rtol=2e-5, atol=2e-5)

    # 3) explicit mask, normalize=True (deterministic mask, no fully-masked column)
    hh = jnp.arange(H)[None, :, None]
    ww = jnp.arange(W)[None, None, :]
    bb = jnp.arange(B)[:, None, None]
    mask = ((hh + ww + bb) % 3 == 0)
    pos_m = jax.block_until_ready(
        position_embedding_sine(x, mask=mask, num_pos_feats=num_pos_feats,
                                normalize=True))
    ref_m = _reference(mask, num_pos_feats, 10000.0, True, 2.0 * math.pi)
    np.testing.assert_allclose(np.asarray(pos_m), np.asarray(ref_m),
                               rtol=2e-5, atol=2e-5)

    print("KERNEL_OK")
</pallas_src>

<mosaic_0001>
module attributes {stable_mosaic.version = 11 : i64} {
  func.func @kernel(%arg0: i32, %arg1: i32, %arg2: i32, %arg3: memref<1x256xf32, #tpu.memory_space<vmem>>, %arg4: memref<16x1xf32, #tpu.memory_space<vmem>>, %arg5: memref<16x1xf32, #tpu.memory_space<vmem>>, %arg6: memref<1x16x256xf32, #tpu.memory_space<vmem>>) attributes {dimension_semantics = [#tpu.dimension_semantics<parallel>, #tpu.dimension_semantics<parallel>, #tpu.dimension_semantics<parallel>], iteration_bounds = array<i64: 2, 2, 1>, scalar_prefetch = 0 : i64, scratch_operands = 0 : i64, tpu.core_type = #tpu.core_type<tc>, window_params = [{transform_indices = @transform_0, window_bounds = array<i64: 1, 256>}, {transform_indices = @transform_1, window_bounds = array<i64: 16, 1>}, {transform_indices = @transform_2, window_bounds = array<i64: 16, 1>}, {transform_indices = @transform_3, window_bounds = array<i64: 1, 16, 256>}]} {
    %c0 = arith.constant 0 : index
    %c0_0 = arith.constant 0 : index
    %0 = vector.load %arg3[%c0, %c0_0] : memref<1x256xf32, #tpu.memory_space<vmem>>, vector<1x256xf32>
    %c0_1 = arith.constant 0 : index
    %c0_2 = arith.constant 0 : index
    %1 = vector.load %arg4[%c0_1, %c0_2] : memref<16x1xf32, #tpu.memory_space<vmem>>, vector<16x1xf32>
    %2 = vector.broadcast %0 : vector<1x256xf32> to vector<16x256xf32>
    %3 = vector.broadcast %1 : vector<16x1xf32> to vector<16x256xf32>
    %4 = arith.mulf %2, %3 : vector<16x256xf32>
    %c0_3 = arith.constant 0 : index
    %c0_4 = arith.constant 0 : index
    %5 = vector.load %arg5[%c0_3, %c0_4] : memref<16x1xf32, #tpu.memory_space<vmem>>, vector<16x1xf32>
    %6 = vector.broadcast %5 : vector<16x1xf32> to vector<16x256xf32>
    %7 = arith.addf %4, %6 : vector<16x256xf32>
    %8 = math.sin %7 : vector<16x256xf32>
    %c0_5 = arith.constant 0 : index
    %c0_6 = arith.constant 0 : index
    %c0_7 = arith.constant 0 : index
    %9 = vector.load %arg6[%c0_5, %c0_6, %c0_7] : memref<1x16x256xf32, #tpu.memory_space<vmem>>, vector<1x16x256xf32>
    %10 = vector.shape_cast %9 : vector<1x16x256xf32> to vector<16x256xf32>
    %11 = vector.shape_cast %8 : vector<16x256xf32> to vector<1x16x256xf32>
    tpu.vector_store %arg6[%c0_5, %c0_6, %c0_7], %11 {strides = array<i32>} : memref<1x16x256xf32, #tpu.memory_space<vmem>>, vector<1x16x256xf32>,
    return
  }
  func.func @transform_0(%arg0: i32, %arg1: i32, %arg2: i32) -> (i32, i32) {
    %c0_i32 = arith.constant 0 : i32
    %c0_i32_0 = arith.constant 0 : i32
    return %c0_i32, %arg2 : i32, i32
  }
  func.func @transform_1(%arg0: i32, %arg1: i32, %arg2: i32) -> (i32, i32) {
    %c0_i32 = arith.constant 0 : i32
    %c0_i32_0 = arith.constant 0 : i32
    return %arg1, %c0_i32 : i32, i32
  }
  func.func @transform_2(%arg0: i32, %arg1: i32, %arg2: i32) -> (i32, i32) {
    %c0_i32 = arith.constant 0 : i32
    %c0_i32_0 = arith.constant 0 : i32
    return %arg1, %c0_i32 : i32, i32
  }
  func.func @transform_3(%arg0: i32, %arg1: i32, %arg2: i32) -> (i32, i32, i32) {
    %c0_i32 = arith.constant 0 : i32
    return %arg0, %arg1, %arg2 : i32, i32, i32
  }
}

</mosaic_0001>

<bundles_post_ra>
// kernel: tpu_custom_call.1
= control target key start
LH: loop header
LB: loop body
LE: loop exit
PB: predicated region body
PF: predicated region fallthrough
CT: control target
= control target key end

     0   :  { %8 = vsyncpa [#allocation3], 0  ;;  %s1548_s0 = inlined_call_operand.vmem [shape: f32[1,256], index: 0, kind: input, shape index: {}]   ;;  %s1549_s1 = inlined_call_operand.vmem [shape: f32[32,1], index: 1, kind: input, shape index: {}]   ;;  %s1550_s2 = inlined_call_operand.vmem [shape: f32[32,1], index: 2, kind: input, shape index: {}]   ;;  %s1551_s3 = inlined_call_operand.hbm [shape: f32[2,32,256], index: 3, kind: output, shape index: {}]  }
   0x1   :  { %10 = vsyncpa [#allocation3 + $0x1], 0  ;;  %s1100_s12 = smov 0   ;;  %s1102_s13 = smov 0  }
   0x2   :  { %s1104_s14 = smov 0   ;;  %s1106_s15 = smov 0  }
   0x3   :  { %s1108_s16 = smov 0   ;;  %s1110_s17 = smov 0  }
   0x4   :  { %s1112_s18 = smov 0   ;;  %s1114_s19 = smov 0  }
   0x5 LB: > { %s825_s20 = sadd.s32 4294967295, %s1068_s19   ;;  %s826_s21 = sadd.s32 4294967294, %s1068_s19   ;;  %s1068_s19 = sphi %s1114_s19, %s16_s19   ;;  %s1064_s18 = sphi %s1112_s18, %s1564_s18   ;;  %s1060_s17 = sphi %s1110_s17, %s1563_s17   ;;  %s1056_s16 = sphi %s1108_s16, %s1562_s16   ;;  %s1052_s15 = sphi %s1106_s15, %s1561_s15   ;;  %s1048_s14 = sphi %s1104_s14, %s1560_s14   ;;  %s1044_s13 = sphi %s1102_s13, %s1559_s13   ;;  %s1040_s12 = sphi %s1100_s12, %s1558_s12  }
   0x6   : > { %s31_s22 = sadd.s32 1, %s1060_s17  ;;  %s35_s23 = sadd.s32 1, %s1064_s18 }
   0x7   : > { %p33_p0 = scmp.ge.s32.totalorder %s31_s22, 2  ;;  %p134_p1 = scmp.ne.s32.totalorder %s1048_s14, %s1044_s13 }
   0x8   : > { %p135_p2 = scmp.eq.s32.totalorder %s825_s20, 3  ;;  %p140_p5 = scmp.ne.s32.totalorder %s1044_s13, %s1040_s12 }
   0x9   : > { %s1566_s22 = smov (%p33_p0, %s31_s22), 0  ;;  %s1568_s23 = smov (!%p33_p0, %s35_s23), %s1064_s18 }
   0xa   : > { %s118_s24 = ssub.s32 %s1060_s17, %s1566_s22  ;;  %p1151_p3 = por %p135_p2, %p134_p1 }
   0xb   : > { %p37_p4 = scmp.ge.s32.totalorder %s1568_s23, 2  ;;  %p141_p6 = scmp.eq.s32.totalorder %s826_s21, 3 }
   0xc   : > { %p830_p7 = scmp.ge.s32.totalorder %s1068_s19, 1  ;;  %p185_p9 = scmp.lt.s32.totalorder %s1068_s19, 5 }
   0xd   : > { %s1570_s23 = smov (%p37_p4, %s1568_s23), 0  ;;  %p1160_p8 = por %p141_p6, %p140_p5 }
   0xe   : > { %s117_s27 = ssub.s32 %s1064_s18, %s1570_s23  ;;  %s124_s28 = sadd.s32 1, %s1048_s14 }
   0xf   : > { %s119_s29 = sor.u32 %s118_s24, %s117_s27  ;;  %p186_p10 = pnand %p830_p7, %p185_p9 }
  0x10   : > { %p122_p11 = scmp.eq.s32.totalorder %s119_s29, 0  ;;  %s832_s4 = sshll.u32 (!%p186_p10), %s1052_s15, 1  ;;  %v1070_v0 = vmov (!%p186_p10), 0   ;;  %v241_v5 = vlaneseq (!%p186_p10)  ;;  %v237_v9 = vld [vmem:[%s1548_s0] sm:$0x3] (!%p186_p10) }
  0x11   : > { %189 = sbr.rel (%p186_p10) target bundleno = 313 (0x139), region = 32  ;;  %957 = vset.pattern.permute.xlu1 (!%p186_p10), %v1070_v0  ;;  %956 = vset.pattern.permute.xlu0 (!%p186_p10), %v1070_v0  ;;  %p224_p12 = scmp.lt.s32.totalorder (!%p186_p10), %s832_s4, 3  ;;  %v1071_v48 = vmov (!%p186_p10), 683565275   ;;  %v1072_v52 = vmov (!%p186_p10), 2475754826  }
  0x12   : > { %s1169_s30 = scalar_select %p122_p11, %s1048_s14, %s124_s28  }
  0x13   : > { %v242_v6 = vshrl.u32 (!%p186_p10), %v241_v5, 7  ;;  %v1073_v54 = vmov (!%p186_p10), 2131351028   ;;  %v1074_v56 = vmov (!%p186_p10), 2102212464   ;;  %s215_s24 = sand.u32 (!%p186_p10), 1, %s1044_s13  }
  0x14   : > { %v1075_v58 = vmov (!%p186_p10), 920167782   ;;  %s831_s27 = sshll.u32 (!%p186_p10), %s215_s24, 5  ;;  %s859_s29 = sshll.u32 (!%p186_p10), %s1052_s15, 2 }
  0x15   : > { %v243_v7 = vsub.s32 (!%p186_p10), 0, %v242_v6  ;;  %v247_v8 = vsub.s32 (!%p186_p10), 1, %v242_v6  ;;  %s1443_s28 = scalar_lea.vmem (!%p186_p10), [#allocation2], %s831_s27 }
  0x16   : > { %s720_s7 = sshll.u32 (!%p186_p10), %s1443_s28, 4  ;;  %s1490_s7 = int_to_ptr.vmem [resolvable:$true] %s720_s7 }
  0x17   : > { %v244_v10 = vrot.slane (!%p186_p10), %v237_v9, %v243_v7  ;;  %v248_v11 = vrot.slane (!%p186_p10), %v237_v9, %v247_v8  ;;  %s974_s10 = scalar_lea.vmem (!%p186_p10), %s1490_s7, 512 }
  0x18   : > { %s1572_s4 = smov (!%p224_p12, %s832_s4), 3  ;;  %p975_p13 = scmp.ne.s32.totalorder %s1490_s7, %s974_s10 }
  0x19   : > { %s833_s5 = sshll.u32 %s1572_s4, 3  ;;  %s855_s4 = sshll.u32 %s1056_s16, 3 }
  0x1a   : > { %s233_s8 = scalar_lea.vmem %s1550_s2, %s833_s5  ;;  %s227_s11 = scalar_lea.vmem %s1549_s1, %s833_s5 }
  0x1b   : > { %v265_v1 = vld [vmem:[%s233_s8] sm:$0xff]  ;;  %v266_v3 = vld [vmem:[%s233_s8 + $0x8] sm:$0xff]  ;;  %s717_s5 = sadd.s32 %s859_s29, %s855_s4  ;;  %s1496_s16 = scalar_lea.sflag [#allocation3], %s215_s24 }
  0x1c   : > { %v238_v2 = vld [vmem:[%s227_s11] sm:$0xff]  ;;  %269 = vperm.xlu1 %957, %v265_v1   ;;  %v239_v4 = vld [vmem:[%s227_s11 + $0x8] sm:$0xff]  ;;  %v1076_v1 = vmov 1326507024   ;;  %s856_s6 = sshll.u32 %s717_s5, 7  ;;  %p976_p0 = pnand %p975_p13, %p1151_p3 }
  0x1d   : > { %253 = vperm.xlu0 %956, %v238_v2   ;;  %s1488_s15 = scalar_lea.hbm %s1551_s3, %s856_s6  ;;  %s1077_s11 = smov [#allocation2]  }
  0x1e   : > { %p977_p1 = pneg %p976_p0  ;;  %s978_s20 = sshll.u32 %s1077_s11, 4  ;;  %s979_s20 = int_to_ptr.vmem [resolvable:$false] %s978_s20 }
  0x1f   : > { %s980_s21 = scalar_lea.vmem %s979_s20, 1024  ;;  %p981_p2 = scmp.lt.s32.totalorder %s1490_s7, %s979_s20 }
  0x20   : > { %274 = vperm.xlu1 %957, %v266_v3   ;;  %p982_p4 = scmp.lt.s32.totalorder %s980_s21, %s974_s10 }
  0x21   : > { %258 = vperm.xlu0 %956, %v239_v4  }
  0x22   : > { %p983_p5 = por %p982_p4, %p981_p2 }
  0x24   : > { %p984_p6 = pnand %p983_p5, %p977_p1 }
  0x9b   : > { %v270_v15 = vpop.permute.xlu1 %269 }
  0x9c   : > { %v254_v12 = vpop.permute.xlu0 %253 }
  0x9d   : > { %v261_v13 = vmul.f32 %v254_v12, %v244_v10  ;;  %v262_v14 = vmul.f32 %v254_v12, %v248_v11 }
  0x9f   : > { %v1181_v16 = vadd.f32 %v270_v15, %v261_v13  ;;  %v1183_v17 = vadd.f32 %v270_v15, %v262_v14  ;;  %v1193_v28 = vpop.permute.xlu1 %274 }
  0xa0   : > { %v259_v18 = vpop.permute.xlu0 %258 }
  0xa1   : > { %v281_v19 = vand.u32 2147483647, %v1181_v16  ;;  %v284_v20 = vand.u32 2139095040, %v1181_v16  ;;  %v385_v21 = vand.u32 2147483647, %v1183_v17  ;;  %v388_v22 = vand.u32 2139095040, %v1183_v17 }
  0xa2   : > { %v263_v24 = vmul.f32 %v259_v18, %v244_v10  ;;  %v1199_v42 = vmul.f32 %v259_v18, %v248_v11  ;;  %vm283_vm14 = vcmp.lt.s32.totalorder %v1181_v16, 0 }
  0xa3   : > { %v285_v23 = vshrl.u32 %v284_v20, 23  ;;  %v288_v25 = vand.u32 8388607, %v281_v19  ;;  %v389_v26 = vshrl.u32 %v388_v22, 23  ;;  %v392_v27 = vand.u32 8388607, %v385_v21 }
  0xa4   : > { %v1196_v30 = vadd.f32 %v1193_v28, %v263_v24  ;;  %vm1285_vm13 = vcmp.le.f32.partialorder %v281_v19, 0.7853982 }
  0xa5   : > { %v836_v29 = vadd.s32 4294967169, %v285_v23  ;;  %v840_v31 = vadd.s32 4294967169, %v389_v26  ;;  %v289_v33 = vor.u32 8388608, %v288_v25  ;;  %v393_v34 = vor.u32 8388608, %v392_v27 }
  0xa6   : > { %v492_v36 = vand.u32 2139095040, %v1196_v30  ;;  %v489_v46 = vand.u32 2147483647, %v1196_v30 }
  0xa7   : > { %v291_v32 = vadd.s32 1, %v836_v29  ;;  %v395_v35 = vadd.s32 1, %v840_v31  ;;  %v1201_v43 = vshll.u32 %v289_v33, 8  ;;  %v1205_v45 = vshll.u32 %v393_v34, 8 }
  0xa8   : > { %v493_v38 = vshrl.u32 %v492_v36, 23 }
  0xa9   : > { %vm292_vm0 = vcmp.gt.s32.totalorder %v291_v32, 0  ;;  %vm396_vm1 = vcmp.gt.s32.totalorder %v395_v35, 0 }
  0xaa   : > { %v293_v37 = vsel %vm292_vm0, %v291_v32, 0  ;;  %v397_v41 = vsel %vm396_vm1, %v395_v35, 0  ;;  %v1209_v51 = vadd.s32 4294967169, %v493_v38 }
  0xab   : > { %v294_v39 = vshrl.u32 %v293_v37, 5  ;;  %v295_v40 = vand.u32 31, %v293_v37  ;;  %v1203_v44 = vshrl.u32 %v397_v41, 5  ;;  %v399_v50 = vand.u32 31, %v397_v41 }
  0xad   : > { %v296_v47 = vsub.s32 32, %v295_v40  ;;  %v298_v49 = vshll.u32 %v1071_v48, %v295_v40  ;;  %v301_v53 = vshll.u32 %v1072_v52, %v295_v40  ;;  %v304_v55 = vshll.u32 %v1073_v54, %v295_v40 }
  0xae   : > { %v307_v57 = vshll.u32 %v1074_v56, %v295_v40  ;;  %v310_v59 = vshll.u32 %v1075_v58, %v295_v40  ;;  %vm313_vm2 = vcmp.lt.s32.totalorder %v294_v39, 1  ;;  %vm314_vm3 = vcmp.lt.s32.totalorder %v294_v39, 2 }
  0xaf   : > { %v299_v60 = vshrl.u32 %v1072_v52, %v296_v47  ;;  %v302_v61 = vshrl.u32 %v1073_v54, %v296_v47  ;;  %v305_v62 = vshrl.u32 %v1074_v56, %v296_v47  ;;  %v297_v63 = vshrl.u32 %v1071_v48, %v296_v47 }
  0xb0   : > { %v308_v0 = vshrl.u32 %v1075_v58, %v296_v47  ;;  %v311_v2 = vshrl.u32 %v1076_v1, %v296_v47  ;;  %v400_v6 = vsub.s32 32, %v399_v50  ;;  %vm315_vm4 = vcmp.lt.s32.totalorder %v294_v39, 3 }
  0xb1   : > { %v300_v3 = vor.u32 %v299_v60, %v298_v49  ;;  %v303_v4 = vor.u32 %v302_v61, %v301_v53  ;;  %v306_v5 = vor.u32 %v305_v62, %v304_v55  ;;  %vm316_vm5 = vcmp.lt.s32.totalorder %v294_v39, 4 }
  0xb2   : > { %v309_v7 = vor.u32 %v308_v0, %v307_v57  ;;  %v312_v8 = vor.u32 %v311_v2, %v310_v59  ;;  %v402_v18 = vshll.u32 %v1071_v48, %v399_v50  ;;  %v403_v23 = vshrl.u32 %v1072_v52, %v400_v6 }
  0xb3   : > { %v317_v9 = vsel %vm313_vm2, %v297_v63, %v300_v3  ;;  %v318_v10 = vsel %vm316_vm5, %v306_v5, 2102212464  ;;  %v321_v11 = vsel %vm313_vm2, %v300_v3, %v303_v4  ;;  %v325_v12 = vsel %vm313_vm2, %v303_v4, %v306_v5 }
  0xb4   : > { %v319_v13 = vsel %vm315_vm4, %v303_v4, %v318_v10  ;;  %v322_v14 = vsel %vm316_vm5, %v309_v7, 920167782  ;;  %v326_v15 = vsel %vm316_vm5, %v312_v8, 1326507024  ;;  %v405_v24 = vshll.u32 %v1072_v52, %v399_v50 }
  0xb5   : > { %v323_v20 = vsel %vm315_vm4, %v306_v5, %v322_v14  ;;  %v327_v22 = vsel %vm315_vm4, %v309_v7, %v326_v15  ;;  %v320_v25 = vsel %vm314_vm3, %v317_v9, %v319_v13  ;;  %v406_v29 = vshrl.u32 %v1073_v54, %v400_v6 }
  0xb6   : > { %v324_v26 = vsel %vm314_vm3, %v321_v11, %v323_v20  ;;  %v328_v27 = vsel %vm314_vm3, %v325_v12, %v327_v22  ;;  %v404_v35 = vor.u32 %v403_v23, %v402_v18  ;;  %v408_v37 = vshll.u32 %v1073_v54, %v399_v50 }
  0xb7   : > { %v1232_v31 = vmul.u32.u64.low %v1201_v43, %v328_v27  ;;  %v1233_v32 = vmul.u32.u64.high %v1201_v43, %v328_v27, %v1232_v31  ;;  %v1236_v33 = vmul.u32.u64.low %v1201_v43, %v324_v26  ;;  %v1237_v34 = vmul.u32.u64.high %v1201_v43, %v324_v26, %v1236_v33 }
  0xb8   : > { %v407_v36 = vor.u32 %v406_v29, %v405_v24  ;;  %v409_v38 = vshrl.u32 %v1074_v56, %v400_v6  ;;  %v401_v40 = vshrl.u32 %v1071_v48, %v400_v6  ;;  %v411_v39 = vshll.u32 %v1074_v56, %v399_v50 }
  0xb9   : > { %v412_v41 = vshrl.u32 %v1075_v58, %v400_v6  ;;  %v415_v47 = vshrl.u32 %v1076_v1, %v400_v6  ;;  %v336_v49 = vmul.u32 %v1201_v43, %v320_v25  ;;  %v414_v55 = vshll.u32 %v1075_v58, %v399_v50 }
  0xba   : > { %v410_v53 = vor.u32 %v409_v38, %v408_v37  ;;  %vm417_vm6 = vcmp.lt.s32.totalorder %v1203_v44, 1  ;;  %vm338_vm7 = vc.u32 %v1233_v32, %v1236_v33  ;;  %v339_v57 = vadd.s32 1, %v1237_v34 }
  0xbb   : > { %v413_v59 = vor.u32 %v412_v41, %v411_v39  ;;  %vm418_vm8 = vcmp.lt.s32.totalorder %v1203_v44, 2  ;;  %v416_v60 = vor.u32 %v415_v47, %v414_v55  ;;  %vm419_vm9 = vcmp.lt.s32.totalorder %v1203_v44, 3 }
  0xbc   : > { %vm420_vm10 = vcmp.lt.s32.totalorder %v1203_v44, 4  ;;  %v425_v61 = vsel %vm417_vm6, %v404_v35, %v407_v36  ;;  %v340_v43 = vsel %vm338_vm7, %v339_v57, %v1237_v34  ;;  %v429_v50 = vsel %vm417_vm6, %v407_v36, %v410_v53 }
  0xbd   : > { %v422_v62 = vsel %vm420_vm10, %v410_v53, 2102212464  ;;  %v426_v63 = vsel %vm420_vm10, %v413_v59, 920167782  ;;  %v341_v0 = vadd.s32 %v340_v43, %v336_v49  ;;  %v421_v2 = vsel %vm417_vm6, %v401_v40, %v404_v35 }
  0xbe   : > { %v427_v3 = vsel %vm419_vm9, %v410_v53, %v426_v63  ;;  %v430_v4 = vsel %vm420_vm10, %v416_v60, 1326507024  ;;  %v423_v5 = vsel %vm419_vm9, %v407_v36, %v422_v62  ;;  %v499_v8 = vadd.s32 1, %v1209_v51 }
  0xbf   : > { %v428_v6 = vsel %vm418_vm8, %v425_v61, %v427_v3  ;;  %v431_v7 = vsel %vm419_vm9, %v413_v59, %v430_v4  ;;  %v342_v9 = vadd.s32 536870912, %v341_v0  ;;  %v496_v15 = vand.u32 8388607, %v489_v46 }
  0xc0   : > { %v432_v10 = vsel %vm418_vm8, %v429_v50, %v431_v7  ;;  %v1260_v11 = vmul.u32.u64.low %v1205_v45, %v428_v6  ;;  %v1261_v12 = vmul.u32.u64.high %v1205_v45, %v428_v6, %v1260_v11  ;;  %vm500_vm11 = vcmp.gt.s32.totalorder %v499_v8, 0 }
  0xc1   : > { %v1265_v13 = vmul.u32.u64.low %v1205_v45, %v432_v10  ;;  %v1266_v14 = vmul.u32.u64.high %v1205_v45, %v432_v10, %v1265_v13  ;;  %v343_v18 = vshrl.u32 %v342_v9, 30  ;;  %v424_v51 = vsel %vm418_vm8, %v421_v2, %v423_v5 }
  0xc2   : > { %v501_v20 = vsel %vm500_vm11, %v499_v8, 0  ;;  %v443_v24 = vadd.s32 1, %v1261_v12  ;;  %v1275_v25 = vadd.f32 %v1193_v28, %v1199_v42  ;;  %v440_v26 = vmul.u32 %v1205_v45, %v424_v51 }
  0xc3   : > { %v503_v22 = vand.u32 31, %v501_v20  ;;  %v344_v23 = vshll.u32 %v343_v18, 30  ;;  %vm442_vm12 = vc.u32 %v1266_v14, %v1260_v11  ;;  %v497_v27 = vor.u32 8388608, %v496_v15 }
  0xc4   : > { %v444_v44 = vsel %vm442_vm12, %v443_v24, %v1261_v12  ;;  %v367_v34 = vsub.s32 4, %v343_v18  ;;  %v337_v28 = vadd.s32 %v1236_v33, %v1233_v32  ;;  %v596_v40 = vand.u32 2139095040, %v1275_v25 }
  0xc5   : > { %v504_v29 = vsub.s32 32, %v503_v22  ;;  %v1280_v31 = vsub.s32 %v341_v0, %v344_v23  ;;  %v445_v35 = vadd.s32 %v444_v44, %v440_v26  ;;  %v1293_v38 = vshll.u32 %v497_v27, 8 }
  0xc6   : > { %v1297_v41 = vshrl.u32 %v501_v20, 5  ;;  %v1303_v32 = vsel %vm283_vm14, %v367_v34, %v343_v18  ;;  %v506_v49 = vshll.u32 %v1071_v48, %v503_v22  ;;  %v509_v57 = vshll.u32 %v1072_v52, %v503_v22 }
  0xc7   : > { %v347_v42 = vsub.s32 0, %v1280_v31  ;;  %v446_v45 = vadd.s32 536870912, %v445_v35  ;;  %v507_v37 = vshrl.u32 %v1072_v52, %v504_v29  ;;  %v510_v19 = vshrl.u32 %v1073_v54, %v504_v29 }
  0xc8   : > { %v513_v47 = vshrl.u32 %v1074_v56, %v504_v29  ;;  %v516_v53 = vshrl.u32 %v1075_v58, %v504_v29  ;;  %v512_v59 = vshll.u32 %v1073_v54, %v503_v22  ;;  %v519_v60 = vshrl.u32 %v1076_v1, %v504_v29 }
  0xc9   : > { %v837_v39 = vmin.u32 %v347_v42, %v1280_v31  ;;  %v1305_v33 = vshrl.u32 %v446_v45, 30  ;;  %v508_v43 = vor.u32 %v507_v37, %v506_v49  ;;  %v515_v62 = vshll.u32 %v1074_v56, %v503_v22 }
  0xca   : > { %v597_v63 = vshrl.u32 %v596_v40, 23  ;;  %v511_v0 = vor.u32 %v510_v19, %v509_v57  ;;  %v514_v2 = vor.u32 %v513_v47, %v512_v59  ;;  %v518_v3 = vshll.u32 %v1075_v58, %v503_v22 }
  0xcb   : > { %v349_v55 = vclz %v837_v39  ;;  %v448_v61 = vshll.u32 %v1305_v33, 30  ;;  %v370_v4 = vsel %vm1285_vm13, 0, %v1303_v32  ;;  %v505_v6 = vshrl.u32 %v1071_v48, %v504_v29 }
  0xcc   : > { %v517_v7 = vor.u32 %v516_v53, %v515_v62  ;;  %v471_v8 = vsub.s32 4, %v1305_v33  ;;  %v520_v9 = vor.u32 %v519_v60, %v518_v3  ;;  %vm521_vm0 = vcmp.lt.s32.totalorder %v1297_v41, 1 }
  0xcd   : > { %v838_v50 = vadd.s32 4294967294, %v349_v55  ;;  %v1318_v5 = vsub.s32 %v445_v35, %v448_v61  ;;  %vm523_vm1 = vcmp.lt.s32.totalorder %v1297_v41, 3  ;;  %vm524_vm2 = vcmp.lt.s32.totalorder %v1297_v41, 4 }
  0xce   : > { %vm387_vm3 = vcmp.lt.s32.totalorder %v1183_v17, 0  ;;  %v526_v18 = vsel %vm524_vm2, %v514_v2, 2102212464  ;;  %v529_v51 = vsel %vm521_vm0, %v508_v43, %v511_v0  ;;  %v530_v23 = vsel %vm524_vm2, %v517_v7, 920167782 }
  0xcf   : > { %vm839_vm15 = vcmp.lt.s32.totalorder %v838_v50, 0  ;;  %v451_v12 = vsub.s32 0, %v1318_v5  ;;  %v533_v24 = vsel %vm521_vm0, %v511_v0, %v514_v2  ;;  %v531_v29 = vsel %vm523_vm1, %v514_v2, %v530_v23 }
  0xd0   : > { %v352_v10 = vsel %vm839_vm15, 0, %v838_v50  ;;  %v534_v44 = vsel %vm524_vm2, %v520_v9, 1326507024  ;;  %vm1337_vm4 = vcmp.le.f32.partialorder %v385_v21, 0.7853982  ;;  %vm522_vm5 = vcmp.lt.s32.totalorder %v1297_v41, 2 }
  0xd1   : > { %v353_v13 = vsub.s32 32, %v352_v10  ;;  %v357_v15 = vsub.s32 4294967266, %v352_v10  ;;  %v354_v20 = vshll.u32 %v1280_v31, %v352_v10  ;;  %v841_v22 = vmin.u32 %v451_v12, %v1318_v5 }
  0xd2   : > { %v525_v31 = vsel %vm521_vm0, %v505_v6, %v508_v43  ;;  %v532_v37 = vsel %vm522_vm5, %v529_v51, %v531_v29  ;;  %v535_v40 = vsel %vm523_vm1, %v517_v7, %v534_v44  ;;  %v593_v55 = vand.u32 2147483647, %v1275_v25 }
  0xd3   : > { %v355_v26 = vshrl.u32 %v337_v28, %v353_v13  ;;  %v358_v27 = vadd.s32 127, %v357_v15  ;;  %v453_v35 = vclz %v841_v22  ;;  %v527_v28 = vsel %vm523_vm1, %v511_v0, %v526_v18 }
  0xd4   : > { %v536_v21 = vsel %vm522_vm5, %v533_v24, %v535_v40  ;;  %v1349_v19 = vmul.u32.u64.low %v1293_v38, %v532_v37  ;;  %v1350_v47 = vmul.u32.u64.high %v1293_v38, %v532_v37, %v1349_v19  ;;  %v441_v57 = vadd.s32 %v1260_v11, %v1266_v14 }
  0xd5   : > { %v356_v42 = vor.u32 %v355_v26, %v354_v20  ;;  %v359_v45 = vshll.u32 %v358_v27, 23  ;;  %v842_v39 = vadd.s32 4294967294, %v453_v35  ;;  %v528_v59 = vsel %vm522_vm5, %v525_v31, %v527_v28 }
  0xd6   : > { %v1353_v49 = vmul.u32.u64.low %v1293_v38, %v536_v21  ;;  %v1354_v53 = vmul.u32.u64.high %v1293_v38, %v536_v21, %v1353_v49  ;;  %v848_v41 = vadd.s32 4294967169, %v597_v63  ;;  %v374_v43 = vadd.s32 3, %v370_v4 }
  0xd7   : > { %v360_v32 = vor.u32 4788187, %v359_v45  ;;  %vm843_vm6 = vcmp.lt.s32.totalorder %v842_v39, 0  ;;  %v363_v61 = vcvt.s32.f32 %v356_v42  ;;  %v472_v2 = vsel %vm387_vm3, %v471_v8, %v1305_v33 }
  0xd8   : > { %v456_v62 = vsel %vm843_vm6, 0, %v842_v39  ;;  %v547_v3 = vadd.s32 1, %v1350_v47  ;;  %v544_v7 = vmul.u32 %v1293_v38, %v528_v59  ;;  %vm546_vm7 = vc.u32 %v1354_v53, %v1349_v19 }
  0xd9   : > { %v361_v60 = vand.u32 2147483647, %v360_v32  ;;  %v457_v50 = vsub.s32 32, %v456_v62  ;;  %v461_v0 = vsub.s32 4294967266, %v456_v62  ;;  %v603_v11 = vadd.s32 1, %v848_v41 }
  0xda   : > { %v458_v14 = vshll.u32 %v1318_v5, %v456_v62  ;;  %v548_v4 = vsel %vm546_vm7, %v547_v3, %v1350_v47  ;;  %v474_v12 = vsel %vm1337_vm4, 0, %v472_v2  ;;  %v600_v23 = vand.u32 8388607, %v593_v55 }
  0xdb   : > { %v364_v6 = vmul.f32 %v363_v61, %v361_v60  ;;  %v459_v63 = vshrl.u32 %v441_v57, %v457_v50  ;;  %v462_v9 = vadd.s32 127, %v461_v0  ;;  %v549_v13 = vadd.s32 %v548_v4, %v544_v7 }
  0xdc   : > { %vm604_vm8 = vcmp.gt.s32.totalorder %v603_v11, 0  ;;  %v478_v22 = vadd.s32 3, %v474_v12  ;;  %v1376_v24 = vand.u32 3, %v374_v43  ;;  %v1387_v45 = vadd.s32 %v1349_v19, %v1354_v53 }
  0xdd   : > { %v365_v10 = vxor.u32 2147483648, %v364_v6  ;;  %v460_v33 = vor.u32 %v459_v63, %v458_v14  ;;  %v463_v8 = vshll.u32 %v462_v9, 23  ;;  %v605_v15 = vsel %vm604_vm8, %v603_v11, 0 }
  0xde   : > { %v550_v18 = vadd.s32 536870912, %v549_v13  ;;  %v607_v51 = vand.u32 31, %v605_v15  ;;  %v1381_v28 = vand.u32 3, %v478_v22  ;;  %vm380_vm9 = vcmp.eq.s32.totalorder %v1376_v24, 2 }
  0xdf   : > { %v366_v38 = vsel %vm283_vm14, %v365_v10, %v364_v6  ;;  %v464_v20 = vor.u32 4788187, %v463_v8  ;;  %v467_v44 = vcvt.s32.f32 %v460_v33  ;;  %v601_v40 = vor.u32 8388608, %v600_v23 }
  0xe0   : > { %v369_v5 = vsel %vm1285_vm13, %v1181_v16, %v366_v38  ;;  %v1378_v26 = vshrl.u32 %v550_v18, 30  ;;  %v608_v27 = vsub.s32 32, %v607_v51  ;;  %vm377_vm10 = vcmp.eq.s32.totalorder %v1376_v24, 0 }
  0xe1   : > { %958 = vcosq.f32 %v369_v5  ;;  %v465_v29 = vand.u32 2147483647, %v464_v20  ;;  %v610_v47 = vshll.u32 %v1071_v48, %v607_v51  ;;  %v613_v32 = vshll.u32 %v1072_v52, %v607_v51 }
  0xe2   : > { %960 = vsinq.f32 %v369_v5  ;;  %v552_v35 = vshll.u32 %v1378_v26, 30  ;;  %v611_v36 = vshrl.u32 %v1072_v52, %v608_v27  ;;  %v614_v42 = vshrl.u32 %v1073_v54, %v608_v27 }
  0xe3   : > { %v468_v31 = vmul.f32 %v467_v44, %v465_v29  ;;  %v620_v39 = vshrl.u32 %v1075_v58, %v608_v27  ;;  %v617_v49 = vshrl.u32 %v1074_v56, %v608_v27  ;;  %vm376_vm11 = vcmp.lt.s32.totalorder %v1376_v24, 2 }
  0xe4   : > { %v1389_v37 = vsub.s32 %v549_v13, %v552_v35  ;;  %v1398_v53 = vshrl.u32 %v605_v15, 5  ;;  %v616_v57 = vshll.u32 %v1073_v54, %v607_v51  ;;  %v619_v59 = vshll.u32 %v1074_v56, %v607_v51 }
  0xe5   : > { %v469_v21 = vxor.u32 2147483648, %v468_v31  ;;  %vm373_vm12 = vweird.f32 %v1181_v16  ;;  %v612_v60 = vor.u32 %v611_v36, %v610_v47  ;;  %v615_v61 = vor.u32 %v614_v42, %v613_v32 }
  0xe6   : > { %v555_v19 = vsub.s32 0, %v1389_v37  ;;  %v623_v52 = vshrl.u32 %v1076_v1, %v608_v27  ;;  %v621_v54 = vor.u32 %v620_v39, %v619_v59  ;;  %v622_v56 = vshll.u32 %v1075_v58, %v607_v51 }
  0xe7   : > { %v470_v41 = vsel %vm387_vm3, %v469_v21, %v468_v31  ;;  %v609_v50 = vshrl.u32 %v1071_v48, %v608_v27  ;;  %v618_v0 = vor.u32 %v617_v49, %v616_v57  ;;  %v1413_v2 = vshll.u32 %v601_v40, 8 }
  0xe8   : > { %v473_v43 = vsel %vm1337_vm4, %v1183_v17, %v470_v41  ;;  %v845_v62 = vmin.u32 %v555_v19, %v1389_v37  ;;  %v624_v6 = vor.u32 %v623_v52, %v622_v56  ;;  %vm625_vm13 = vcmp.lt.s32.totalorder %v1398_v53, 1 }
  0xe9   : > { %962 = vcosq.f32 %v473_v43  ;;  %vm626_vm14 = vcmp.lt.s32.totalorder %v1398_v53, 2  ;;  %vm628_vm15 = vcmp.lt.s32.totalorder %v1398_v53, 4  ;;  %v633_v48 = vsel %vm625_vm13, %v612_v60, %v615_v61 }
  0xea   : > { %964 = vsinq.f32 %v473_v43  ;;  %v557_v1 = vclz %v845_v62  ;;  %vm627_vm0 = vcmp.lt.s32.totalorder %v1398_v53, 3  ;;  %v634_v14 = vsel %vm628_vm15, %v621_v54, 920167782 }
  0xeb   : > { %v959_v3 = vpop.eup %958  ;;  %v630_v9 = vsel %vm628_vm15, %v618_v0, 2102212464  ;;  %v635_v4 = vsel %vm627_vm0, %v618_v0, %v634_v14  ;;  %v637_v10 = vsel %vm625_vm13, %v615_v61, %v618_v0  ;;  %v638_v33 = vsel %vm628_vm15, %v624_v6, 1326507024 }
  0xec   : > { %v961_v7 = vpop.eup %960  ;;  %v381_v34 = vxor.u32 2147483648, %v959_v3  ;;  %v846_v11 = vadd.s32 4294967294, %v557_v1  ;;  %v636_v13 = vsel %vm626_vm14, %v633_v48, %v635_v4  ;;  %v629_v38 = vsel %vm625_vm13, %v609_v50, %v612_v60 }
  0xed   : > { %v378_v58 = vxor.u32 2147483648, %v961_v7  ;;  %v639_v18 = vsel %vm627_vm0, %v621_v54, %v638_v33  ;;  %v631_v22 = vsel %vm627_vm0, %v615_v61, %v630_v9  ;;  %vm484_vm2 = vcmp.eq.s32.totalorder %v1381_v28, 2 }
  0xee   : > { %v382_v63 = vsel %vm380_vm9, %v381_v34, %v961_v7  ;;  %vm847_vm1 = vcmp.lt.s32.totalorder %v846_v11, 0  ;;  %v640_v24 = vsel %vm626_vm14, %v637_v10, %v639_v18  ;;  %vm477_vm3 = vweird.f32 %v1183_v17 }
  0xef   : > { %v379_v12 = vsel %vm377_vm10, %v959_v3, %v378_v58  ;;  %v560_v15 = vsel %vm847_vm1, 0, %v846_v11  ;;  %v1450_v27 = vmul.u32.u64.low %v1413_v2, %v636_v13  ;;  %v1451_v29 = vmul.u32.u64.high %v1413_v2, %v636_v13, %v1450_v27 }
  0xf0   : > { %v383_v8 = vsel %vm376_vm11, %v379_v12, %v382_v63  ;;  %v561_v5 = vsub.s32 32, %v560_v15  ;;  %v565_v20 = vsub.s32 4294967266, %v560_v15  ;;  %v562_v23 = vshll.u32 %v1389_v37, %v560_v15 }
  0xf1   : > { %v384_v51 = vsel %vm373_vm12, nan, %v383_v8  ;;  %v1455_v35 = vmul.u32.u64.low %v1413_v2, %v640_v24  ;;  %v1456_v31 = vmul.u32.u64.high %v1413_v2, %v640_v24, %v1455_v35  ;;  %v632_v37 = vsel %vm626_vm14, %v629_v38, %v631_v22 }
  0xf2   : > { %697 = vst [vmem:[%s1443_s28] sm:$0xff] %v384_v51  ;;  %v563_v16 = vshrl.u32 %v1387_v45, %v561_v5  ;;  %v566_v44 = vadd.s32 127, %v565_v20  ;;  %v651_v32 = vadd.s32 1, %v1451_v29  ;;  %vm481_vm4 = vcmp.eq.s32.totalorder %v1381_v28, 0 }
  0xf3   : > { %v963_v36 = vpop.eup %962  ;;  %vm480_vm5 = vcmp.lt.s32.totalorder %v1381_v28, 2  ;;  %v648_v57 = vmul.u32 %v1413_v2, %v632_v37  ;;  %vm650_vm6 = vc.u32 %v1456_v31, %v1450_v27  ;;  %v575_v43 = vsub.s32 4, %v1378_v26 }
  0xf4   : > { %v965_v42 = vpop.eup %964  ;;  %v485_v40 = vxor.u32 2147483648, %v963_v36  ;;  %v564_v39 = vor.u32 %v563_v16, %v562_v23  ;;  %v567_v21 = vshll.u32 %v566_v44, 23  ;;  %v652_v60 = vsel %vm650_vm6, %v651_v32, %v1451_v29 }
  0xf5   : > { %v482_v47 = vxor.u32 2147483648, %v965_v42  ;;  %v653_v52 = vadd.s32 %v652_v60, %v648_v57  ;;  %vm491_vm7 = vcmp.lt.s32.totalorder %v1196_v30, 0  ;;  %vm490_vm8 = vcmp.le.f32.partialorder %v489_v46, 0.7853982 }
  0xf6   : > { %v486_v45 = vsel %vm484_vm2, %v485_v40, %v965_v42  ;;  %v568_v49 = vor.u32 4788187, %v567_v21  ;;  %v571_v41 = vcvt.s32.f32 %v564_v39  ;;  %v576_v50 = vsel %vm491_vm7, %v575_v43, %v1378_v26 }
  0xf7   : > { %v483_v19 = vsel %vm481_vm4, %v963_v36, %v482_v47  ;;  %v654_v62 = vadd.s32 536870912, %v653_v52  ;;  %v578_v3 = vsel %vm490_vm8, 0, %v576_v50  ;;  %v649_v10 = vadd.s32 %v1450_v27, %v1456_v31 }
  0xf8   : > { %v487_v53 = vsel %vm480_vm5, %v483_v19, %v486_v45  ;;  %v569_v59 = vand.u32 2147483647, %v568_v49  ;;  %v582_v7 = vadd.s32 3, %v578_v3  ;;  %vm581_vm12 = vweird.f32 %v1196_v30 }
  0xf9   : > { %v488_v61 = vsel %vm477_vm3, nan, %v487_v53  ;;  %v655_v28 = vshrl.u32 %v654_v62, 30  ;;  %vm595_vm14 = vcmp.lt.s32.totalorder %v1275_v25, 0  ;;  %vm594_vm15 = vcmp.le.f32.partialorder %v593_v55, 0.7853982 }
  0xfa   : > { %698 = vst [vmem:[%s1443_s28 + $0x8] sm:$0xff] %v488_v61  ;;  %v572_v17 = vmul.f32 %v571_v41, %v569_v59  ;;  %v583_v58 = vand.u32 3, %v582_v7  ;;  %vm685_vm3 = vweird.f32 %v1275_v25 }
  0xfb   : > { %v656_v2 = vshll.u32 %v655_v28, 30  ;;  %v679_v29 = vsub.s32 4, %v655_v28 }
  0xfc   : > { %v573_v54 = vxor.u32 2147483648, %v572_v17  ;;  %vm585_vm10 = vcmp.eq.s32.totalorder %v583_v58, 0  ;;  %vm588_vm11 = vcmp.eq.s32.totalorder %v583_v58, 2  ;;  %vm584_vm13 = vcmp.lt.s32.totalorder %v583_v58, 2 }
  0xfd   : > { %v657_v1 = vsub.s32 %v653_v52, %v656_v2  ;;  %v680_v44 = vsel %vm595_vm14, %v679_v29, %v655_v28 }
  0xfe   : > { %v574_v56 = vsel %vm491_vm7, %v573_v54, %v572_v17  ;;  %v682_v31 = vsel %vm594_vm15, 0, %v680_v44 }
  0xff   : > { %v577_v0 = vsel %vm490_vm8, %v1196_v30, %v574_v56  ;;  %v659_v6 = vsub.s32 0, %v657_v1  ;;  %v686_v36 = vadd.s32 3, %v682_v31 }
 0x100   : > { %966 = vcosq.f32 %v577_v0 }
 0x101   : > { %968 = vsinq.f32 %v577_v0  ;;  %v849_v34 = vmin.u32 %v659_v6, %v657_v1  ;;  %v687_v42 = vand.u32 3, %v686_v36 }
 0x103   : > { %v661_v48 = vclz %v849_v34  ;;  %vm692_vm0 = vcmp.eq.s32.totalorder %v687_v42, 2  ;;  %vm689_vm1 = vcmp.eq.s32.totalorder %v687_v42, 0  ;;  %vm688_vm2 = vcmp.lt.s32.totalorder %v687_v42, 2 }
 0x105   : > { %v850_v11 = vadd.s32 4294967294, %v661_v48 }
 0x107   : > { %vm851_vm9 = vcmp.lt.s32.totalorder %v850_v11, 0 }
 0x108   : > { %v664_v26 = vsel %vm851_vm9, 0, %v850_v11 }
 0x109   : > { %v665_v12 = vsub.s32 32, %v664_v26  ;;  %v669_v13 = vsub.s32 4294967266, %v664_v26  ;;  %v666_v15 = vshll.u32 %v657_v1, %v664_v26 }
 0x10a   : > { %v967_v14 = vpop.eup %966 }
 0x10b   : > { %v969_v63 = vpop.eup %968  ;;  %v589_v9 = vxor.u32 2147483648, %v967_v14  ;;  %v667_v38 = vshrl.u32 %v649_v10, %v665_v12  ;;  %v670_v18 = vadd.s32 127, %v669_v13 }
 0x10c   : > { %v586_v46 = vxor.u32 2147483648, %v969_v63 }
 0x10d   : > { %v590_v4 = vsel %vm588_vm11, %v589_v9, %v969_v63  ;;  %v668_v5 = vor.u32 %v667_v38, %v666_v15  ;;  %v671_v20 = vshll.u32 %v670_v18, 23 }
 0x10e   : > { %v587_v33 = vsel %vm585_vm10, %v967_v14, %v586_v46 }
 0x10f   : > { %v591_v8 = vsel %vm584_vm13, %v587_v33, %v590_v4  ;;  %v672_v22 = vor.u32 4788187, %v671_v20  ;;  %v675_v24 = vcvt.s32.f32 %v668_v5 }
 0x110   : > { %v592_v51 = vsel %vm581_vm12, nan, %v591_v8 }
 0x111   : > { %699 = vst [vmem:[%s1443_s28 + $0x10] sm:$0xff] %v592_v51  ;;  %v673_v23 = vand.u32 2147483647, %v672_v22 }
 0x113   : > { %v676_v27 = vmul.f32 %v675_v24, %v673_v23 }
 0x115   : > { %v677_v16 = vxor.u32 2147483648, %v676_v27 }
 0x117   : > { %v678_v30 = vsel %vm595_vm14, %v677_v16, %v676_v27 }
 0x118   : > { %v681_v35 = vsel %vm594_vm15, %v1275_v25, %v678_v30 }
 0x119   : > { %970 = vcosq.f32 %v681_v35 }
 0x11a   : > { %972 = vsinq.f32 %v681_v35 }
 0x123   : > { %v971_v40 = vpop.eup %970 }
 0x124   : > { %v973_v39 = vpop.eup %972  ;;  %v693_v21 = vxor.u32 2147483648, %v971_v40 }
 0x125   : > { %v690_v55 = vxor.u32 2147483648, %v973_v39 }
 0x126   : > { %v694_v37 = vsel %vm692_vm0, %v693_v21, %v973_v39 }
 0x127   : > { %v691_v47 = vsel %vm689_vm1, %v971_v40, %v690_v55 }
 0x128   : > { %v695_v32 = vsel %vm688_vm2, %v691_v47, %v694_v37 }
 0x129   : > { %v696_v45 = vsel %vm685_vm3, nan, %v695_v32 }
 0x12a   : > { %700 = vst [vmem:[%s1443_s28 + $0x18] sm:$0xff] %v696_v45 }
 0x12b   : > { %987 = shalt.err (!%p984_p6)
}
 0x12c   : > { %s988_s24 = scalar_lea.hbm %s1488_s15, 512  ;;  %s992_s29 = scalar_lea.hbm %s1551_s3, 2048 }
 0x12d   : > { %p989_p7 = scmp.ne.s32.totalorder %s1488_s15, %s988_s24  ;;  %p993_p11 = scmp.lt.u32.totalorder %s1488_s15, %s1551_s3 }
 0x12e   : > { %p994_p12 = scmp.lt.u32.totalorder %s992_s29, %s988_s24  ;;  %p996_p0 = scmp.lt.u32.totalorder %s988_s24, %s1488_s15 }
 0x12f   : > { %p990_p9 = pnand %p989_p7, %p1151_p3 }
 0x130   : > { %p995_p13 = por %p994_p12, %p993_p11 }
 0x131   : > { %p991_p10 = pneg %p990_p9 }
 0x132   : > { %p997_p1 = por %p996_p0, %p995_p13 }
 0x134   : > { %p998_p2 = pnand %p997_p1, %p991_p10 }
 0x136   : > { %1001 = shalt.err (!%p998_p2)
}
 0x137   : > { %s1078_s6 = smov 256   ;;  %s1079_s8 = smov 16  }
 0x138   : > { %876 = dma.vmem_to_hbm [thread:$0]  (%p1151_p3), %s1490_s7, 512, %s1488_s15, %s1496_s16, %s1078_s6, %s1078_s6, %s1079_s8  }
 0x139 PF: > { %p882_p4 = scmp.ge.s32.totalorder %s1068_s19, 2  ;;  %s735_s9 = sand.u32 1, %s1040_s12  }
 0x13a   : > { %s736_s10 = scalar_lea.sflag [#allocation3], %s735_s9 }
 0x13b   : > { %p879_p5 = pnand %p882_p4, %p1160_p8 }
 0x13d   : > { %1035 = dma.done.wait (!%p879_p5), %s736_s10, 512  }
 0x13e   : > { %1037 = vsyncadd (!%p879_p5), %s736_s10, 4294966784  ;;  %s16_s19 = sadd.s32 1, %s1068_s19   ;;  %s1558_s12 = smov %s1044_s13 }
 0x13f   : > { %p13_p6 = scmp.ge.s32.totalorder %s16_s19, 6   ;;  %s1559_s13 = smov %s1048_s14 }
 0x140   : > { %s1560_s14 = smov %s1169_s30  ;;  %s1561_s15 = smov %s1060_s17 }
 0x141   : > { %s1562_s16 = smov %s1064_s18  ;;  %s1563_s17 = smov %s1566_s22 }
 0x142   : > { %s1564_s18 = smov %s1570_s23  ;;  %15 = sbr.rel (!%p13_p6) target bundleno = 5 (0x5), region = 73 }
 0x149   :  { %741 = vsyncpa [#allocation3], 1 }
 0x14a   :  { %743 = vsyncpa [#allocation3 + $0x1], 1 }

</bundles_post_ra>
